<compile_context>
chip_gen: v5e
topology: v5e:2x2
jax: 0.10.0
libtpu: 0.0.40
codegen_flags: <defaults>
</compile_context>

<pallas_src>
import functools
import math

import jax
import jax.numpy as jnp
from jax import lax
from jax.experimental import pallas as pl
from jax.experimental.pallas import tpu as pltpu


def _round_up(n, m):
    return (n + m - 1) // m * m


def _cdiv(a, b):
    return (a + b - 1) // b


def lookahead_kernel(x_ref, halo_ref, w_ref, o_ref, tail_ref, *,
                     context, t_tile, halo_rows, seq_len, acc_dtype):
    """One time tile of the Lookahead convolution.

    x_ref    : (t_tile, BF)       current time tile (rows past seq_len in the
                                  partial last block are garbage; masked below)
    halo_ref : (halo_rows, BF)    first rows of the *next* tile (clamped on the
                                  last tile; any rows >= seq_len are masked)
    w_ref    : (context+1, BF)    per-tap, lane-dense weights
    o_ref    : (t_tile, BF)
    tail_ref : (2*halo_rows, BF)  tiny scratch splicing tile tail + halo
    """
    bf = x_ref.shape[1]
    t_main = t_tile - halo_rows

    tile_start = pl.program_id(0) * t_tile
    # Tap reads at local row index >= limit fall past the end of the sequence
    # and must contribute zero (the Lookahead zero padding).
    limit = seq_len - tile_start

    # Stage the tiny tail window: last halo_rows rows of this tile, then the
    # halo.  Only 2*halo_rows rows of store traffic per tile (vs. a full-tile
    # staging copy in the previous version).
    tail_ref[pl.ds(0, halo_rows), :] = x_ref[pl.ds(t_main, halo_rows), :]
    tail_ref[pl.ds(halo_rows, halo_rows), :] = halo_ref[...]

    def tap_sum(src_ref, rows, region_off, masked):
        # out[region_off + r] = sum_c src[r + c] * w[c],  r in [0, rows)
        if masked:
            rid = lax.broadcasted_iota(jnp.int32, (rows, bf), 0)
        acc = None
        for c in range(context + 1):
            v = src_ref[pl.ds(c, rows), :].astype(acc_dtype)
            if masked:
                # Global row tile_start + region_off + r + c must be < seq_len.
                v = jnp.where(rid < limit - region_off - c, v, 0.0)
            term = v * w_ref[pl.ds(c, 1), :].astype(acc_dtype)
            acc = term if acc is None else acc + term
        return acc.astype(o_ref.dtype)

    def emit(masked):
        if t_main > 0:
            # Main region: all taps stay inside x_ref.
            o_ref[pl.ds(0, t_main), :] = tap_sum(x_ref, t_main, 0, masked)
        # Tail region: taps may cross into the halo via the tiny scratch.
        o_ref[pl.ds(t_main, halo_rows), :] = tap_sum(
            tail_ref, halo_rows, t_main, masked)

    # Only tiles whose tap window crosses seq_len pay for masking.
    needs_mask = tile_start + t_tile + context > seq_len

    @pl.when(needs_mask)
    def _():
        emit(True)

    @pl.when(jnp.logical_not(needs_mask))
    def _():
        emit(False)


def lookahead(x, weight, context, *, t_tile=None, acc_dtype=jnp.float32):
    """Lookahead forward. x: (T, B, F), weight: (F, context+1) -> (T, B, F).

    Output dtype follows x (single downcast at the store).  For bf16 inputs on
    v6e/v7x pass acc_dtype=jnp.bfloat16 to halve vreg/VMEM pressure.  B*F being
    a multiple of 128 gives lane-dense loads/stores; other widths are still
    correct (masked stores).
    """
    assert context > 0
    T, B, F = x.shape
    assert weight.shape == (F, context + 1)
    BF = B * F
    itemsize = jnp.dtype(x.dtype).itemsize
    acc_itemsize = jnp.dtype(acc_dtype).itemsize

    # Dtype-aware sublane quantum: 8 (f32) / 16 (bf16) / 32 (int8, fp8).
    quantum = max(8, 32 // itemsize)
    halo_rows = _round_up(context, quantum)

    # Degenerate tiny-sequence guard: keep every block inside the array.
    T_k = max(T, halo_rows)

    # Generation-aware sizing: 64 MiB-VMEM parts (v7x) get smaller tiles and a
    # lower VMEM ceiling than 128 MiB parts (v5e/v6e).
    try:
        vmem_cap = int(pltpu.get_tpu_info().vmem_capacity_bytes)
    except Exception:  # conservative fallback if the query is unavailable
        vmem_cap = 64 * 1024 * 1024
    if vmem_cap <= 64 * 1024 * 1024:
        tile_bytes, vmem_ceiling = 4 * 1024 * 1024, 48 * 1024 * 1024
    else:
        tile_bytes, vmem_ceiling = 6 * 1024 * 1024, 96 * 1024 * 1024

    if t_tile is None:
        t_tile = tile_bytes // max(1, BF * itemsize)
        # Keep >= ~4 grid steps so the "parallel" axis feeds both v7x cores.
        t_tile = min(t_tile, _round_up(_cdiv(T_k, 4), halo_rows))
    t_tile = max(halo_rows, t_tile // halo_rows * halo_rows)
    t_tile = min(t_tile, _round_up(T_k, halo_rows))

    def vmem_need(tt):
        return (2 * 2 * tt * BF * itemsize              # in + out, double-buffered
                + 2 * halo_rows * BF * itemsize         # halo, double-buffered
                + 2 * halo_rows * BF * itemsize         # tail scratch
                + 2 * (context + 1) * BF * acc_itemsize  # weights
                + 3 * tt * BF * acc_itemsize)           # live elementwise temps

    while t_tile > halo_rows and vmem_need(t_tile) > 0.8 * vmem_ceiling:
        t_tile = max(halo_rows, (t_tile // 2) // halo_rows * halo_rows)

    nt = _cdiv(T_k, t_tile)
    blocks_per_tile = t_tile // halo_rows
    n_halo_blocks = _cdiv(T_k, halo_rows)

    # Free reshape; no padding even when T % t_tile != 0 (the ragged tail is
    # handled with partial blocks + in-kernel masking).
    x2 = x.reshape(T, BF)
    if T_k != T:  # only for T < one sublane quantum (< 32 rows): negligible
        x2 = jnp.pad(x2, ((0, T_k - T), (0, 0)))

    # weight (F, C+1) -> (C+1, B*F) with w_flat[c, b*F + f] = weight[f, c].
    w_flat = jnp.tile(weight.T.astype(acc_dtype), (1, B))

    kernel = functools.partial(lookahead_kernel, context=context,
                               t_tile=t_tile, halo_rows=halo_rows,
                               seq_len=T, acc_dtype=acc_dtype)

    flops = 2 * (context + 1) * T * BF
    bytes_accessed = (T * BF * itemsize                 # x read
                      + nt * halo_rows * BF * itemsize  # tiny halo re-read
                      + T * BF * itemsize               # out write
                      + (context + 1) * BF * acc_itemsize)

    vmem_limit = int(min(vmem_ceiling,
                         max(32 * 1024 * 1024, int(1.25 * vmem_need(t_tile)))))

    out2 = pl.pallas_call(
        kernel,
        out_shape=jax.ShapeDtypeStruct((T_k, BF), x.dtype),
        grid_spec=pltpu.PrefetchScalarGridSpec(
            num_scalar_prefetch=0,
            grid=(nt,),
            in_specs=[
                # Current time tile.
                pl.BlockSpec((t_tile, BF), lambda i: (i, 0)),
                # Halo: first rows of the next tile (clamped on the last tile;
                # the kernel masks every halo tap that falls past seq_len).
                pl.BlockSpec(
                    (halo_rows, BF),
                    lambda i: (jnp.minimum((i + 1) * blocks_per_tile,
                                           n_halo_blocks - 1), 0)),
                # Per-tap weights, constant block -> resident across the grid.
                pl.BlockSpec((context + 1, BF), lambda i: (0, 0)),
            ],
            out_specs=pl.BlockSpec((t_tile, BF), lambda i: (i, 0)),
            scratch_shapes=[pltpu.VMEM((2 * halo_rows, BF), x.dtype)],
        ),
        compiler_params=pltpu.CompilerParams(
            dimension_semantics=("parallel",),
            vmem_limit_bytes=vmem_limit),
        cost_estimate=pl.CostEstimate(
            flops=flops, transcendentals=0, bytes_accessed=bytes_accessed),
    )(x2, x2, w_flat)

    if T_k != T:
        out2 = out2[:T]
    return out2.reshape(T, B, F)


def lookahead_ref(x, weight, context):
    """Pure-JAX reference mirroring the PyTorch forward exactly."""
    T, B, F = x.shape
    x_pad = jnp.concatenate([x, jnp.zeros((context, B, F), x.dtype)], axis=0)
    windows = jnp.stack([x_pad[i:i + context + 1] for i in range(T)], axis=0)
    return jnp.einsum("tcbf,fc->tbf", windows, weight)


if __name__ == "__main__":
    context = 3
    B, F = 4, 32          # B*F = 128 -> lane-dense blocks

    key = jax.random.PRNGKey(0)
    k_w, k1, k2, k3 = jax.random.split(key, 4)

    # PyTorch-style init: uniform(-stdv, stdv), stdv = 1/sqrt(context+1).
    stdv = 1.0 / math.sqrt(context + 1)
    weight = jax.random.uniform(k_w, (F, context + 1), dtype=jnp.float32,
                                minval=-stdv, maxval=stdv)

    def run_case(T, k, **kw):
        x = jax.random.normal(k, (T, B, F), dtype=jnp.float32)
        out = jax.block_until_ready(lookahead(x, weight, context, **kw))
        ref = lookahead_ref(x, weight, context)
        assert out.shape == (T, B, F), out.shape
        err = float(jnp.max(jnp.abs(out - ref)))
        assert err < 1e-5, err

    # Divisible T: multi-tile, halo passing, masking only on the last tile.
    run_case(64, k1)
    # Ragged T: partial last tile (2 valid rows < context) -> masked last AND
    # masked penultimate tile, partial halo blocks.
    run_case(34, k2, t_tile=16)
    # Short ragged T: single-quantum tiles, exercises the t_main == 0 path.
    run_case(13, k3)

    print("KERNEL_OK")
</pallas_src>

<mosaic_0001>
module attributes {stable_mosaic.version = 11 : i64} {
  func.func @lookahead_kernel(%arg0: i32, %arg1: memref<16x128xf32, #tpu.memory_space<vmem>>, %arg2: memref<8x128xf32, #tpu.memory_space<vmem>>, %arg3: memref<4x128xf32, #tpu.memory_space<vmem>>, %arg4: memref<16x128xf32, #tpu.memory_space<vmem>>, %arg5: memref<16x128xf32, #tpu.memory_space<vmem>>) attributes {dimension_semantics = [#tpu.dimension_semantics<parallel>], iteration_bounds = array<i64: 4>, scalar_prefetch = 0 : i64, scratch_operands = 1 : i64, tpu.core_type = #tpu.core_type<tc>, window_params = [{transform_indices = @transform_0, window_bounds = array<i64: 16, 128>}, {transform_indices = @transform_1, window_bounds = array<i64: 8, 128>}, {pipeline_mode = #tpu.pipeline_mode<synchronous>, transform_indices = @transform_2, window_bounds = array<i64: 4, 128>}, {transform_indices = @transform_3, window_bounds = array<i64: 16, 128>}]} {
    %c16_i32 = arith.constant 16 : i32
    %0 = arith.muli %arg0, %c16_i32 : i32
    %c64_i32 = arith.constant 64 : i32
    %1 = arith.subi %c64_i32, %0 : i32
    %c8 = arith.constant 8 : index
    %c0 = arith.constant 0 : index
    %2 = vector.load %arg1[%c8, %c0] : memref<16x128xf32, #tpu.memory_space<vmem>>, vector<8x128xf32>
    %c0_0 = arith.constant 0 : index
    %c0_1 = arith.constant 0 : index
    %3 = vector.load %arg5[%c0_0, %c0_1] : memref<16x128xf32, #tpu.memory_space<vmem>>, vector<8x128xf32>
    tpu.vector_store %arg5[%c0_0, %c0_1], %2 {strides = array<i32>} : memref<16x128xf32, #tpu.memory_space<vmem>>, vector<8x128xf32>,
    %c0_2 = arith.constant 0 : index
    %c0_3 = arith.constant 0 : index
    %4 = vector.load %arg2[%c0_2, %c0_3] : memref<8x128xf32, #tpu.memory_space<vmem>>, vector<8x128xf32>
    %c8_4 = arith.constant 8 : index
    %c0_5 = arith.constant 0 : index
    %5 = vector.load %arg5[%c8_4, %c0_5] : memref<16x128xf32, #tpu.memory_space<vmem>>, vector<8x128xf32>
    tpu.vector_store %arg5[%c8_4, %c0_5], %4 {strides = array<i32>} : memref<16x128xf32, #tpu.memory_space<vmem>>, vector<8x128xf32>,
    %c16_i32_6 = arith.constant 16 : i32
    %6 = arith.addi %0, %c16_i32_6 : i32
    %c3_i32 = arith.constant 3 : i32
    %7 = arith.addi %6, %c3_i32 : i32
    %c64_i32_7 = arith.constant 64 : i32
    %8 = arith.cmpi sgt, %7, %c64_i32_7 : i32
    %9 = arith.extui %8 : i1 to i32
    %c0_i32 = arith.constant 0 : i32
    %10 = arith.cmpi ne, %9, %c0_i32 : i32
    scf.if %10 {
      %14 = tpu.iota {dimensions = array<i32: 0>} : vector<8x128xi32>
      %c0_9 = arith.constant 0 : index
      %c0_10 = arith.constant 0 : index
      %15 = vector.load %arg1[%c0_9, %c0_10] : memref<16x128xf32, #tpu.memory_space<vmem>>, vector<8x128xf32>
      %c0_i32_11 = arith.constant 0 : i32
      %16 = arith.subi %1, %c0_i32_11 : i32
      %c0_i32_12 = arith.constant 0 : i32
      %17 = arith.subi %16, %c0_i32_12 : i32
      %18 = vector.broadcast %17 : i32 to vector<8x128xi32>
      %19 = arith.cmpi slt, %14, %18 : vector<8x128xi32>
      %cst = arith.constant 0.000000e+00 : f32
      %20 = vector.broadcast %cst : f32 to vector<8x128xf32>
      %21 = arith.select %19, %15, %20 : vector<8x128xi1>, vector<8x128xf32>
      %c0_13 = arith.constant 0 : index
      %c0_14 = arith.constant 0 : index
      %22 = vector.load %arg3[%c0_13, %c0_14] : memref<4x128xf32, #tpu.memory_space<vmem>>, vector<1x128xf32>
      %23 = vector.broadcast %22 : vector<1x128xf32> to vector<8x128xf32>
      %24 = arith.mulf %21, %23 : vector<8x128xf32>
      %c1 = arith.constant 1 : index
      %c0_15 = arith.constant 0 : index
      %25 = vector.load %arg1[%c1, %c0_15] : memref<16x128xf32, #tpu.memory_space<vmem>>, vector<8x128xf32>
      %c0_i32_16 = arith.constant 0 : i32
      %26 = arith.subi %1, %c0_i32_16 : i32
      %c1_i32 = arith.constant 1 : i32
      %27 = arith.subi %26, %c1_i32 : i32
      %28 = vector.broadcast %27 : i32 to vector<8x128xi32>
      %29 = arith.cmpi slt, %14, %28 : vector<8x128xi32>
      %cst_17 = arith.constant 0.000000e+00 : f32
      %30 = vector.broadcast %cst_17 : f32 to vector<8x128xf32>
      %31 = arith.select %29, %25, %30 : vector<8x128xi1>, vector<8x128xf32>
      %c1_18 = arith.constant 1 : index
      %c0_19 = arith.constant 0 : index
      %32 = vector.load %arg3[%c1_18, %c0_19] : memref<4x128xf32, #tpu.memory_space<vmem>>, vector<1x128xf32>
      %33 = vector.broadcast %32 : vector<1x128xf32> to vector<8x128xf32>
      %34 = arith.mulf %31, %33 : vector<8x128xf32>
      %35 = arith.addf %24, %34 : vector<8x128xf32>
      %c2 = arith.constant 2 : index
      %c0_20 = arith.constant 0 : index
      %36 = vector.load %arg1[%c2, %c0_20] : memref<16x128xf32, #tpu.memory_space<vmem>>, vector<8x128xf32>
      %c0_i32_21 = arith.constant 0 : i32
      %37 = arith.subi %1, %c0_i32_21 : i32
      %c2_i32 = arith.constant 2 : i32
      %38 = arith.subi %37, %c2_i32 : i32
      %39 = vector.broadcast %38 : i32 to vector<8x128xi32>
      %40 = arith.cmpi slt, %14, %39 : vector<8x128xi32>
      %cst_22 = arith.constant 0.000000e+00 : f32
      %41 = vector.broadcast %cst_22 : f32 to vector<8x128xf32>
      %42 = arith.select %40, %36, %41 : vector<8x128xi1>, vector<8x128xf32>
      %c2_23 = arith.constant 2 : index
      %c0_24 = arith.constant 0 : index
      %43 = vector.load %arg3[%c2_23, %c0_24] : memref<4x128xf32, #tpu.memory_space<vmem>>, vector<1x128xf32>
      %44 = vector.broadcast %43 : vector<1x128xf32> to vector<8x128xf32>
      %45 = arith.mulf %42, %44 : vector<8x128xf32>
      %46 = arith.addf %35, %45 : vector<8x128xf32>
      %c3 = arith.constant 3 : index
      %c0_25 = arith.constant 0 : index
      %47 = vector.load %arg1[%c3, %c0_25] : memref<16x128xf32, #tpu.memory_space<vmem>>, vector<8x128xf32>
      %c0_i32_26 = arith.constant 0 : i32
      %48 = arith.subi %1, %c0_i32_26 : i32
      %c3_i32_27 = arith.constant 3 : i32
      %49 = arith.subi %48, %c3_i32_27 : i32
      %50 = vector.broadcast %49 : i32 to vector<8x128xi32>
      %51 = arith.cmpi slt, %14, %50 : vector<8x128xi32>
      %cst_28 = arith.constant 0.000000e+00 : f32
      %52 = vector.broadcast %cst_28 : f32 to vector<8x128xf32>
      %53 = arith.select %51, %47, %52 : vector<8x128xi1>, vector<8x128xf32>
      %c3_29 = arith.constant 3 : index
      %c0_30 = arith.constant 0 : index
      %54 = vector.load %arg3[%c3_29, %c0_30] : memref<4x128xf32, #tpu.memory_space<vmem>>, vector<1x128xf32>
      %55 = vector.broadcast %54 : vector<1x128xf32> to vector<8x128xf32>
      %56 = arith.mulf %53, %55 : vector<8x128xf32>
      %57 = arith.addf %46, %56 : vector<8x128xf32>
      %c0_31 = arith.constant 0 : index
      %c0_32 = arith.constant 0 : index
      %58 = vector.load %arg4[%c0_31, %c0_32] : memref<16x128xf32, #tpu.memory_space<vmem>>, vector<8x128xf32>
      tpu.vector_store %arg4[%c0_31, %c0_32], %57 {strides = array<i32>} : memref<16x128xf32, #tpu.memory_space<vmem>>, vector<8x128xf32>,
      %59 = tpu.iota {dimensions = array<i32: 0>} : vector<8x128xi32>
      %c0_33 = arith.constant 0 : index
      %c0_34 = arith.constant 0 : index
      %60 = vector.load %arg5[%c0_33, %c0_34] : memref<16x128xf32, #tpu.memory_space<vmem>>, vector<8x128xf32>
      %c8_i32 = arith.constant 8 : i32
      %61 = arith.subi %1, %c8_i32 : i32
      %c0_i32_35 = arith.constant 0 : i32
      %62 = arith.subi %61, %c0_i32_35 : i32
      %63 = vector.broadcast %62 : i32 to vector<8x128xi32>
      %64 = arith.cmpi slt, %59, %63 : vector<8x128xi32>
      %cst_36 = arith.constant 0.000000e+00 : f32
      %65 = vector.broadcast %cst_36 : f32 to vector<8x128xf32>
      %66 = arith.select %64, %60, %65 : vector<8x128xi1>, vector<8x128xf32>
      %c0_37 = arith.constant 0 : index
      %c0_38 = arith.constant 0 : index
      %67 = vector.load %arg3[%c0_37, %c0_38] : memref<4x128xf32, #tpu.memory_space<vmem>>, vector<1x128xf32>
      %68 = vector.broadcast %67 : vector<1x128xf32> to vector<8x128xf32>
      %69 = arith.mulf %66, %68 : vector<8x128xf32>
      %c1_39 = arith.constant 1 : index
      %c0_40 = arith.constant 0 : index
      %70 = vector.load %arg5[%c1_39, %c0_40] : memref<16x128xf32, #tpu.memory_space<vmem>>, vector<8x128xf32>
      %c8_i32_41 = arith.constant 8 : i32
      %71 = arith.subi %1, %c8_i32_41 : i32
      %c1_i32_42 = arith.constant 1 : i32
      %72 = arith.subi %71, %c1_i32_42 : i32
      %73 = vector.broadcast %72 : i32 to vector<8x128xi32>
      %74 = arith.cmpi slt, %59, %73 : vector<8x128xi32>
      %cst_43 = arith.constant 0.000000e+00 : f32
      %75 = vector.broadcast %cst_43 : f32 to vector<8x128xf32>
      %76 = arith.select %74, %70, %75 : vector<8x128xi1>, vector<8x128xf32>
      %c1_44 = arith.constant 1 : index
      %c0_45 = arith.constant 0 : index
      %77 = vector.load %arg3[%c1_44, %c0_45] : memref<4x128xf32, #tpu.memory_space<vmem>>, vector<1x128xf32>
      %78 = vector.broadcast %77 : vector<1x128xf32> to vector<8x128xf32>
      %79 = arith.mulf %76, %78 : vector<8x128xf32>
      %80 = arith.addf %69, %79 : vector<8x128xf32>
      %c2_46 = arith.constant 2 : index
      %c0_47 = arith.constant 0 : index
      %81 = vector.load %arg5[%c2_46, %c0_47] : memref<16x128xf32, #tpu.memory_space<vmem>>, vector<8x128xf32>
      %c8_i32_48 = arith.constant 8 : i32
      %82 = arith.subi %1, %c8_i32_48 : i32
      %c2_i32_49 = arith.constant 2 : i32
      %83 = arith.subi %82, %c2_i32_49 : i32
      %84 = vector.broadcast %83 : i32 to vector<8x128xi32>
      %85 = arith.cmpi slt, %59, %84 : vector<8x128xi32>
      %cst_50 = arith.constant 0.000000e+00 : f32
      %86 = vector.broadcast %cst_50 : f32 to vector<8x128xf32>
      %87 = arith.select %85, %81, %86 : vector<8x128xi1>, vector<8x128xf32>
      %c2_51 = arith.constant 2 : index
      %c0_52 = arith.constant 0 : index
      %88 = vector.load %arg3[%c2_51, %c0_52] : memref<4x128xf32, #tpu.memory_space<vmem>>, vector<1x128xf32>
      %89 = vector.broadcast %88 : vector<1x128xf32> to vector<8x128xf32>
      %90 = arith.mulf %87, %89 : vector<8x128xf32>
      %91 = arith.addf %80, %90 : vector<8x128xf32>
      %c3_53 = arith.constant 3 : index
      %c0_54 = arith.constant 0 : index
      %92 = vector.load %arg5[%c3_53, %c0_54] : memref<16x128xf32, #tpu.memory_space<vmem>>, vector<8x128xf32>
      %c8_i32_55 = arith.constant 8 : i32
      %93 = arith.subi %1, %c8_i32_55 : i32
      %c3_i32_56 = arith.constant 3 : i32
      %94 = arith.subi %93, %c3_i32_56 : i32
      %95 = vector.broadcast %94 : i32 to vector<8x128xi32>
      %96 = arith.cmpi slt, %59, %95 : vector<8x128xi32>
      %cst_57 = arith.constant 0.000000e+00 : f32
      %97 = vector.broadcast %cst_57 : f32 to vector<8x128xf32>
      %98 = arith.select %96, %92, %97 : vector<8x128xi1>, vector<8x128xf32>
      %c3_58 = arith.constant 3 : index
      %c0_59 = arith.constant 0 : index
      %99 = vector.load %arg3[%c3_58, %c0_59] : memref<4x128xf32, #tpu.memory_space<vmem>>, vector<1x128xf32>
      %100 = vector.broadcast %99 : vector<1x128xf32> to vector<8x128xf32>
      %101 = arith.mulf %98, %100 : vector<8x128xf32>
      %102 = arith.addf %91, %101 : vector<8x128xf32>
      %c8_60 = arith.constant 8 : index
      %c0_61 = arith.constant 0 : index
      %103 = vector.load %arg4[%c8_60, %c0_61] : memref<16x128xf32, #tpu.memory_space<vmem>>, vector<8x128xf32>
      tpu.vector_store %arg4[%c8_60, %c0_61], %102 {strides = array<i32>} : memref<16x128xf32, #tpu.memory_space<vmem>>, vector<8x128xf32>,
    } else {
    }
    %true = arith.constant true
    %11 = arith.xori %8, %true : i1
    %12 = arith.extui %11 : i1 to i32
    %c0_i32_8 = arith.constant 0 : i32
    %13 = arith.cmpi ne, %12, %c0_i32_8 : i32
    scf.if %13 {
      %c0_9 = arith.constant 0 : index
      %c0_10 = arith.constant 0 : index
      %14 = vector.load %arg1[%c0_9, %c0_10] : memref<16x128xf32, #tpu.memory_space<vmem>>, vector<8x128xf32>
      %c0_11 = arith.constant 0 : index
      %c0_12 = arith.constant 0 : index
      %15 = vector.load %arg3[%c0_11, %c0_12] : memref<4x128xf32, #tpu.memory_space<vmem>>, vector<1x128xf32>
      %16 = vector.broadcast %15 : vector<1x128xf32> to vector<8x128xf32>
      %17 = arith.mulf %14, %16 : vector<8x128xf32>
      %c1 = arith.constant 1 : index
      %c0_13 = arith.constant 0 : index
      %18 = vector.load %arg1[%c1, %c0_13] : memref<16x128xf32, #tpu.memory_space<vmem>>, vector<8x128xf32>
      %c1_14 = arith.constant 1 : index
      %c0_15 = arith.constant 0 : index
      %19 = vector.load %arg3[%c1_14, %c0_15] : memref<4x128xf32, #tpu.memory_space<vmem>>, vector<1x128xf32>
      %20 = vector.broadcast %19 : vector<1x128xf32> to vector<8x128xf32>
      %21 = arith.mulf %18, %20 : vector<8x128xf32>
      %22 = arith.addf %17, %21 : vector<8x128xf32>
      %c2 = arith.constant 2 : index
      %c0_16 = arith.constant 0 : index
      %23 = vector.load %arg1[%c2, %c0_16] : memref<16x128xf32, #tpu.memory_space<vmem>>, vector<8x128xf32>
      %c2_17 = arith.constant 2 : index
      %c0_18 = arith.constant 0 : index
      %24 = vector.load %arg3[%c2_17, %c0_18] : memref<4x128xf32, #tpu.memory_space<vmem>>, vector<1x128xf32>
      %25 = vector.broadcast %24 : vector<1x128xf32> to vector<8x128xf32>
      %26 = arith.mulf %23, %25 : vector<8x128xf32>
      %27 = arith.addf %22, %26 : vector<8x128xf32>
      %c3 = arith.constant 3 : index
      %c0_19 = arith.constant 0 : index
      %28 = vector.load %arg1[%c3, %c0_19] : memref<16x128xf32, #tpu.memory_space<vmem>>, vector<8x128xf32>
      %c3_20 = arith.constant 3 : index
      %c0_21 = arith.constant 0 : index
      %29 = vector.load %arg3[%c3_20, %c0_21] : memref<4x128xf32, #tpu.memory_space<vmem>>, vector<1x128xf32>
      %30 = vector.broadcast %29 : vector<1x128xf32> to vector<8x128xf32>
      %31 = arith.mulf %28, %30 : vector<8x128xf32>
      %32 = arith.addf %27, %31 : vector<8x128xf32>
      %c0_22 = arith.constant 0 : index
      %c0_23 = arith.constant 0 : index
      %33 = vector.load %arg4[%c0_22, %c0_23] : memref<16x128xf32, #tpu.memory_space<vmem>>, vector<8x128xf32>
      tpu.vector_store %arg4[%c0_22, %c0_23], %32 {strides = array<i32>} : memref<16x128xf32, #tpu.memory_space<vmem>>, vector<8x128xf32>,
      %c0_24 = arith.constant 0 : index
      %c0_25 = arith.constant 0 : index
      %34 = vector.load %arg5[%c0_24, %c0_25] : memref<16x128xf32, #tpu.memory_space<vmem>>, vector<8x128xf32>
      %c0_26 = arith.constant 0 : index
      %c0_27 = arith.constant 0 : index
      %35 = vector.load %arg3[%c0_26, %c0_27] : memref<4x128xf32, #tpu.memory_space<vmem>>, vector<1x128xf32>
      %36 = vector.broadcast %35 : vector<1x128xf32> to vector<8x128xf32>
      %37 = arith.mulf %34, %36 : vector<8x128xf32>
      %c1_28 = arith.constant 1 : index
      %c0_29 = arith.constant 0 : index
      %38 = vector.load %arg5[%c1_28, %c0_29] : memref<16x128xf32, #tpu.memory_space<vmem>>, vector<8x128xf32>
      %c1_30 = arith.constant 1 : index
      %c0_31 = arith.constant 0 : index
      %39 = vector.load %arg3[%c1_30, %c0_31] : memref<4x128xf32, #tpu.memory_space<vmem>>, vector<1x128xf32>
      %40 = vector.broadcast %39 : vector<1x128xf32> to vector<8x128xf32>
      %41 = arith.mulf %38, %40 : vector<8x128xf32>
      %42 = arith.addf %37, %41 : vector<8x128xf32>
      %c2_32 = arith.constant 2 : index
      %c0_33 = arith.constant 0 : index
      %43 = vector.load %arg5[%c2_32, %c0_33] : memref<16x128xf32, #tpu.memory_space<vmem>>, vector<8x128xf32>
      %c2_34 = arith.constant 2 : index
      %c0_35 = arith.constant 0 : index
      %44 = vector.load %arg3[%c2_34, %c0_35] : memref<4x128xf32, #tpu.memory_space<vmem>>, vector<1x128xf32>
      %45 = vector.broadcast %44 : vector<1x128xf32> to vector<8x128xf32>
      %46 = arith.mulf %43, %45 : vector<8x128xf32>
      %47 = arith.addf %42, %46 : vector<8x128xf32>
      %c3_36 = arith.constant 3 : index
      %c0_37 = arith.constant 0 : index
      %48 = vector.load %arg5[%c3_36, %c0_37] : memref<16x128xf32, #tpu.memory_space<vmem>>, vector<8x128xf32>
      %c3_38 = arith.constant 3 : index
      %c0_39 = arith.constant 0 : index
      %49 = vector.load %arg3[%c3_38, %c0_39] : memref<4x128xf32, #tpu.memory_space<vmem>>, vector<1x128xf32>
      %50 = vector.broadcast %49 : vector<1x128xf32> to vector<8x128xf32>
      %51 = arith.mulf %48, %50 : vector<8x128xf32>
      %52 = arith.addf %47, %51 : vector<8x128xf32>
      %c8_40 = arith.constant 8 : index
      %c0_41 = arith.constant 0 : index
      %53 = vector.load %arg4[%c8_40, %c0_41] : memref<16x128xf32, #tpu.memory_space<vmem>>, vector<8x128xf32>
      tpu.vector_store %arg4[%c8_40, %c0_41], %52 {strides = array<i32>} : memref<16x128xf32, #tpu.memory_space<vmem>>, vector<8x128xf32>,
    } else {
    }
    return
  }
  func.func @transform_0(%arg0: i32) -> (i32, i32) {
    %c0_i32 = arith.constant 0 : i32
    %c0_i32_0 = arith.constant 0 : i32
    return %arg0, %c0_i32 : i32, i32
  }
  func.func @transform_1(%arg0: i32) -> (i32, i32) {
    %c1_i32 = arith.constant 1 : i32
    %0 = arith.addi %arg0, %c1_i32 : i32
    %c2_i32 = arith.constant 2 : i32
    %1 = arith.muli %0, %c2_i32 : i32
    %c7_i32 = arith.constant 7 : i32
    %2 = arith.minsi %1, %c7_i32 : i32
    %c0_i32 = arith.constant 0 : i32
    %c0_i32_0 = arith.constant 0 : i32
    return %2, %c0_i32 : i32, i32
  }
  func.func @transform_2(%arg0: i32) -> (i32, i32) {
    %c0_i32 = arith.constant 0 : i32
    %c0_i32_0 = arith.constant 0 : i32
    %c0_i32_1 = arith.constant 0 : i32
    return %c0_i32, %c0_i32_0 : i32, i32
  }
  func.func @transform_3(%arg0: i32) -> (i32, i32) {
    %c0_i32 = arith.constant 0 : i32
    %c0_i32_0 = arith.constant 0 : i32
    return %arg0, %c0_i32 : i32, i32
  }
}

</mosaic_0001>

<bundles_post_ra>
// kernel: tpu_custom_call.1
= control target key start
LH: loop header
LB: loop body
LE: loop exit
PB: predicated region body
PF: predicated region fallthrough
CT: control target
= control target key end

     0   :  { %s1112_s0 = inlined_call_operand.hbm [shape: f32[64,128], index: 0, kind: input, shape index: {}]   ;;  %s1113_s1 = inlined_call_operand.hbm [shape: f32[64,128], index: 1, kind: input, shape index: {}]   ;;  %s1114_s2 = inlined_call_operand.hbm [shape: f32[4,128], index: 2, kind: input, shape index: {}]   ;;  %s1115_s3 = inlined_call_operand.hbm [shape: f32[64,128], index: 3, kind: output, shape index: {}]  }
   0x1   :  { %1120 = sst [smem:[#allocation16_spill]] %s1112_s0 }
   0x2   :  { %1121 = sst [smem:[#allocation17_spill]] %s1114_s2 }
   0x3   :  { %8 = vsyncpa [#allocation4], 0 }
   0x4   :  { %10 = vsyncpa [#allocation4 + $0x1], 0 }
   0x5   :  { %11 = vsyncpa [#allocation7], 0 }
   0x6   :  { %13 = vsyncpa [#allocation7 + $0x1], 0 }
   0x7   :  { %14 = vsyncpa [#allocation5], 0 }
   0x8   :  { %16 = vsyncpa [#allocation5 + $0x1], 0  ;;  %s867_s12 = smov 0   ;;  %s869_s13 = smov 0  }
   0x9   :  { %s871_s14 = smov 0   ;;  %s873_s15 = smov 0  }
   0xa   :  { %s875_s16 = smov 0   ;;  %s877_s17 = smov 0  }
   0xb   :  { %s879_s18 = smov 0  }
   0xc LB: > { %1122 = sst [smem:[#allocation14_spill]] %s836_s17  ;;  %s901_s19 = sadd.s32 4294967295, %s840_s18   ;;  %s840_s18 = sphi %s879_s18, %s1145_s18   ;;  %s836_s17 = sphi %s877_s17, %s1139_s17   ;;  %s832_s16 = sphi %s875_s16, %s1144_s16   ;;  %s828_s15 = sphi %s873_s15, %s1143_s15   ;;  %s824_s14 = sphi %s871_s14, %s1142_s14   ;;  %s820_s13 = sphi %s869_s13, %s1141_s13   ;;  %s816_s12 = sphi %s867_s12, %s1140_s12  }
   0xd   : > { %s511_s20 = sadd.s32 4294967294, %s840_s18   ;;  %p42_p0 = scmp.ne.s32.totalorder %s832_s16, %s828_s15 }
   0xe   : > { %p1116_p1 = scmp.eq.s32.totalorder %s901_s19, 0  ;;  %p76_p2 = scmp.ne.s32.totalorder %s820_s13, %s816_s12 }
   0xf   : > { %p121_p3 = scmp.eq.s32.totalorder %s901_s19, 3  ;;  %p127_p5 = scmp.eq.s32.totalorder %s511_s20, 3 }
  0x10   : > { %p911_p4 = por %p1116_p1, %p42_p0  ;;  %p917_p6 = por %p76_p2, %p1116_p1 }
  0x11   : > { %p514_p7 = scmp.ge.s32.totalorder %s840_s18, 1  ;;  %p922_p8 = por %p127_p5, %p42_p0 }
  0x12   : > { %p134_p9 = scmp.lt.s32.totalorder %s840_s18, 5  ;;  %s1126_s2 = sld [smem:[#allocation17_spill]] }
  0x13   : > { %s842_s28 = smov [#allocation8]   ;;  %s939_s30 = sadd.s32 1, %s840_s18  }
  0x14   : > { %p930_p10 = pnand %p514_p7, %p134_p9  ;;  %s148_s29 = sshll.u32 %s842_s28, 4  ;;  %s149_s29 = int_to_ptr.vmem [resolvable:$true] %s148_s29 }
  0x15   : > { %s29_s4 = sadd.s32 1, %s836_s17  ;;  %s26_s5 = ssub.s32 %s840_s18, %s939_s30 }
  0x16   : > { %p556_p11 = pneg %p930_p10  ;;  %p27_p13 = scmp.eq.s32.totalorder %s26_s5, 0 }
  0x17   : > { %p36_p0 = scmp.ne.s32.totalorder %s836_s17, %s832_s16  ;;  %p1118_p2 = scmp.eq.s32.totalorder %s840_s18, 0 }
  0x18   : > { %s146_s26 = sshll.u32 %s1126_s2, 4  ;;  %p557_p12 = pnand %p556_p11, %p1116_p1  ;;  %s147_s26 = int_to_ptr.hbm [resolvable:$true] %s146_s26 }
  0x19   : > { %p1117_p5 = scmp.lt.s32.totalorder %s840_s18, 4  ;;  %p38_p7 = por %p1118_p2, %p36_p0 }
  0x1a   : > { %559 = dma.hbm_to_vmem [thread:$0]  (!%p557_p12), %s147_s26, 64, %s149_s29, [#allocation7]  }
  0x1b   : > { %s949_s6 = scalar_select %p27_p13, %s836_s17, %s29_s4  }
  0x1c   : > { %p955_p9 = por %p121_p3, %p36_p0  ;;  %s159_s8 = sand.u32 1, %s836_s17  }
  0x1d   : > { %1128 = sst [smem:[#allocation15_spill]] %s949_s6  ;;  %s540_s9 = sshll.u32 %s840_s18, 4 }
  0x1e   : > { %s517_s10 = sshll.u32 %s159_s8, 4  ;;  %s1130_s0 = sld [smem:[#allocation16_spill]] }
  0x1f   : > { %s163_s25 = scalar_lea.vmem [#allocation3], %s517_s10  ;;  %p966_p11 = pnand %p1117_p5, %p38_p7 }
  0x20   : > { %s171_s26 = sshll.u32 %s163_s25, 4  ;;  %s160_s29 = scalar_lea.sflag [#allocation4], %s159_s8  ;;  %s172_s26 = int_to_ptr.vmem [resolvable:$true] %s171_s26 }
  0x21   : > { %p686_p12 = pneg %p966_p11 }
  0x24   : > { %s168_s20 = scalar_lea.hbm %s1130_s0, %s540_s9  ;;  %s689_s11 = scalar_lea.hbm %s1130_s0, 64 }
  0x25   : > { %s169_s24 = sshll.u32 %s168_s20, 4  ;;  %s170_s24 = int_to_ptr.hbm [resolvable:$true] %s169_s24 }
  0x26   : > { %s682_s4 = sshra.s32 %s170_s24, 4  ;;  %s683_s4 = int_to_ptr.hbm [resolvable:$true] %s682_s4 }
  0x27   : > { %s684_s5 = scalar_lea.hbm %s683_s4, 16  ;;  %p690_p7 = scmp.lt.s32.totalorder %s683_s4, %s1130_s0 }
  0x28   : > { %p685_p3 = scmp.ne.s32.totalorder %s683_s4, %s684_s5  ;;  %p691_p1 = scmp.lt.s32.totalorder %s689_s11, %s684_s5 }
  0x2a   : > { %p687_p13 = pnand %p686_p12, %p685_p3  ;;  %p692_p5 = por %p691_p1, %p690_p7 }
  0x2c   : > { %p688_p0 = pneg %p687_p13 }
  0x2e   : > { %p693_p2 = pnand %p692_p5, %p688_p0 }
  0x30   : > { %696 = shalt.err (!%p693_p2)
}
  0x31   : > { %s843_s8 = smov 128   ;;  %s844_s25 = smov 8  }
  0x32   : > { %563 = dma.hbm_to_vmem [thread:$0]  (!%p966_p11), %s170_s24, 256, %s172_s26, %s160_s29, %s843_s8, %s843_s8, %s844_s25  }
  0x33   : > { %s536_s9 = sshll.u32 %s840_s18, 1  ;;  %s63_s10 = sadd.s32 1, %s824_s14 }
  0x34   : > { %s537_s4 = sadd.s32 2, %s536_s9  ;;  %p70_p3 = scmp.ne.s32.totalorder %s824_s14, %s820_s13 }
  0x35   : > { %p54_p1 = scmp.lt.s32.totalorder %s537_s4, 7  ;;  %s539_s5 = sadd.s32 2, %s537_s4 }
  0x36   : > { %p58_p2 = scmp.lt.s32.totalorder %s539_s5, 7  ;;  %p1132_p5 = scmp.eq.s32.totalorder %s840_s18, 0 }
  0x37   : > { %s1147_s4 = smov (!%p54_p1, %s537_s4), 7  ;;  %s181_s12 = sand.u32 1, %s840_s18  }
  0x38   : > { %p986_p12 = por %p70_p3, %p1132_p5  ;;  %s1149_s5 = smov (!%p58_p2, %s539_s5), 7 }
  0x39   : > { %s183_s28 = sand.u32 1, %s824_s14   ;;  %s60_s24 = ssub.s32 %s1147_s4, %s1149_s5 }
  0x3a   : > { %p61_p11 = scmp.eq.s32.totalorder %s60_s24, 0  ;;  %s520_s26 = sshll.u32 %s183_s28, 3 }
  0x3b   : > { %s522_s29 = sshll.u32 %s1147_s4, 3  ;;  %s185_s0 = scalar_lea.vmem [#allocation6], %s520_s26 }
  0x3c   : > { %s993_s20 = scalar_select %p61_p11, %s824_s14, %s63_s10  }
  0x3d   : > { %s193_s9 = scalar_lea.hbm %s1113_s1, %s522_s29  ;;  %s197_s2 = sshll.u32 %s185_s0, 4  ;;  %s198_s2 = int_to_ptr.vmem [resolvable:$true] %s197_s2 }
  0x3e   : > { %s195_s6 = sshll.u32 %s193_s9, 4  ;;  %p1134_p13 = scmp.lt.s32.totalorder %s840_s18, 4  ;;  %s196_s6 = int_to_ptr.hbm [resolvable:$true] %s195_s6 }
  0x3f   : > { %s182_s5 = scalar_lea.sflag [#allocation7], %s181_s12  ;;  %s712_s4 = sshra.s32 %s196_s6, 4  ;;  %s713_s4 = int_to_ptr.hbm [resolvable:$true] %s712_s4 }
  0x40   : > { %p1002_p0 = pnand %p1134_p13, %p986_p12  ;;  %s714_s10 = scalar_lea.hbm %s713_s4, 8 }
  0x41   : > { %p715_p7 = scmp.ne.s32.totalorder %s713_s4, %s714_s10  ;;  %s719_s24 = scalar_lea.hbm %s1113_s1, 64 }
  0x42   : > { %p716_p3 = pneg %p1002_p0  ;;  %p720_p5 = scmp.lt.s32.totalorder %s713_s4, %s1113_s1 }
  0x43   : > { %p721_p12 = scmp.lt.s32.totalorder %s719_s24, %s714_s10 }
  0x44   : > { %p717_p1 = pnand %p716_p3, %p715_p7 }
  0x45   : > { %p722_p11 = por %p721_p12, %p720_p5 }
  0x46   : > { %p718_p2 = pneg %p717_p1 }
  0x48   : > { %p723_p13 = pnand %p722_p11, %p718_p2 }
  0x4a   : > { %726 = shalt.err (!%p723_p13)
}
  0x4b   : > { %566 = dma.hbm_to_vmem [thread:$0]  (!%p1002_p0), %s196_s6, 128, %s198_s2, %s182_s5  }
  0x4c   : > { %206 = sbr.rel (%p930_p10) target bundleno = 154 (0x9a), region = 32  ;;  %s1019_s12 = sand.u32 (!%p930_p10), 1, %s832_s16  }
  0x4d   : > { %s524_s29 = sshll.u32 (!%p930_p10), %s1019_s12, 4  ;;  %s209_s8 = scalar_lea.sflag (!%p930_p10), [#allocation4], %s1019_s12 }
  0x4e   : > { %s1023_s25 = scalar_lea.vmem (!%p930_p10), [#allocation3], %s524_s29 }
  0x51   : > { %799 = dma.done.wait (%p911_p4), %s209_s8, 256  }
  0x52   : > { %801 = vsyncadd (%p911_p4), %s209_s8, 4294967040  ;;  %s218_s2 = sand.u32 1, %s901_s19   ;;  %s220_s17 = sand.u32 1, %s820_s13  }
  0x53   : > { %s525_s27 = sshll.u32 %s220_s17, 3  ;;  %s219_s6 = scalar_lea.sflag [#allocation7], %s218_s2 }
  0x54   : > { %s222_s9 = scalar_lea.vmem [#allocation6], %s525_s27 }
  0x55   : > { %803 = dma.done.wait (%p917_p6), %s219_s6, 128  }
  0x56   : > { %805 = vsyncadd (%p917_p6), %s219_s6, 4294967168  ;;  %p1136_p10 = scmp.eq.s32.totalorder %s901_s19, 0 }
  0x58   : > { %807 = dma.done.wait (%p1136_p10), [#allocation7], 64   ;;  %p1137_p0 = pmov %p1136_p10 }
  0x59   : > { %s1040_s21 = sshll.u32 %s901_s19, 4  ;;  %v264_v0 = vld [vmem:[%s1023_s25 + $0x8] sm:$0xff]  ;;  %v266_v1 = vld [vmem:[%s222_s9] sm:$0xff]  ;;  %s1045_s22 = scalar_lea.vmem [#allocation9], %s524_s29 }
  0x5a   : > { %809 = vsyncadd (%p1137_p0), [#allocation7], 4294967232  ;;  %s263_s5 = ssub.s32 64, %s1040_s21  ;;  %s268_s4 = sadd.s32 19, %s1040_s21  ;;  %265 = vst [vmem:[#allocation2] sm:$0xff] %v264_v0 }
  0x5b   : > { %267 = vst [vmem:[#allocation2 + $0x8] sm:$0xff] %v266_v1  ;;  %p529_p4 = scmp.le.s32.totalorder %s268_s4, 64 }
  0x5c   : > { %s283_s19 = ssub.s32 (!%p529_p4), 63, %s1040_s21  ;;  %s292_s10 = ssub.s32 (!%p529_p4), 62, %s1040_s21 }
  0x5d   : > { %272 = sbr.rel (%p529_p4) target bundleno = 116 (0x74), region = 48  ;;  %s301_s0 = ssub.s32 (!%p529_p4), 61, %s1040_s21 }
  0x5e   : > { %s311_s28 = ssub.s32 (!%p529_p4), 56, %s1040_s21  ;;  %s319_s24 = ssub.s32 (!%p529_p4), 55, %s1040_s21 }
  0x5f   : > { %s328_s11 = ssub.s32 (!%p529_p4), 54, %s1040_s21  ;;  %s337_s26 = ssub.s32 (!%p529_p4), 53, %s1040_s21 }
  0x62   : > { %v273_v2 = vlaneseq  ;;  %v275_v3 = vld [vmem:[%s1023_s25] sm:$0xff]  ;;  %v276_v5 = vstv %s263_s5  ;;  %v284_v7 = vstv %s283_s19  ;;  %v293_v11 = vstv %s292_s10 }
  0x63   : > { %v636_v4 = vld [vmem:[#allocation8] ss:$0 sm:$0xff]  ;;  %v282_v6 = vld [vmem:[%s1023_s25 + $0x1] sm:$0xff]  ;;  %v302_v15 = vstv %s301_s0  ;;  %v312_v29 = vstv %s311_s28  ;;  %v320_v30 = vstv %s319_s24 }
  0x64   : > { %v637_v8 = vld [vmem:[#allocation8 + $0x1] ss:$0 sm:$0xff]  ;;  %v274_v9 = vshrl.u32 %v273_v2, 7  ;;  %v291_v10 = vld [vmem:[%s1023_s25 + $0x2] sm:$0xff]  ;;  %v640_v17 = vld [vmem:[#allocation8] ss:$0 sm:$0xff]  ;;  %v329_v31 = vstv %s328_s11  ;;  %v338_v38 = vstv %s337_s26 }
  0x65   : > { %v638_v12 = vld [vmem:[#allocation8 + $0x2] ss:$0 sm:$0xff]  ;;  %v300_v13 = vld [vmem:[%s1023_s25 + $0x3] sm:$0xff]  ;;  %v641_v27 = vld [vmem:[#allocation8 + $0x1] ss:$0 sm:$0xff] }
  0x66   : > { %v639_v14 = vld [vmem:[#allocation8 + $0x3] ss:$0 sm:$0xff]  ;;  %vm277_vm0 = vcmp.lt.s32.totalorder %v274_v9, %v276_v5  ;;  %vm285_vm1 = vcmp.lt.s32.totalorder %v274_v9, %v284_v7  ;;  %vm294_vm2 = vcmp.lt.s32.totalorder %v274_v9, %v293_v11  ;;  %vm303_vm3 = vcmp.lt.s32.totalorder %v274_v9, %v302_v15  ;;  %v642_v32 = vld [vmem:[#allocation8 + $0x2] ss:$0 sm:$0xff] }
  0x67   : > { %v310_v16 = vld [vmem:[#allocation2] sm:$0xff]  ;;  %v278_v18 = vsel %vm277_vm0, %v275_v3, 0.0  ;;  %v286_v19 = vsel %vm285_vm1, %v282_v6, 0.0  ;;  %v295_v20 = vsel %vm294_vm2, %v291_v10, 0.0  ;;  %v304_v26 = vsel %vm303_vm3, %v300_v13, 0.0 }
  0x68   : > { %v318_v21 = vld [vmem:[#allocation2 + $0x1] sm:$0xff]  ;;  %v281_v23 = vmul.f32 %v636_v4, %v278_v18  ;;  %v289_v24 = vmul.f32 %v637_v8, %v286_v19  ;;  %v298_v25 = vmul.f32 %v638_v12, %v295_v20  ;;  %v307_v28 = vmul.f32 %v639_v14, %v304_v26 }
  0x69   : > { %v327_v22 = vld [vmem:[#allocation2 + $0x2] sm:$0xff]  ;;  %vm313_vm4 = vcmp.lt.s32.totalorder %v274_v9, %v312_v29  ;;  %vm321_vm5 = vcmp.lt.s32.totalorder %v274_v9, %v320_v30  ;;  %vm330_vm6 = vcmp.lt.s32.totalorder %v274_v9, %v329_v31  ;;  %vm339_vm7 = vcmp.lt.s32.totalorder %v274_v9, %v338_v38 }
  0x6a   : > { %v290_v33 = vadd.f32 %v289_v24, %v281_v23  ;;  %v314_v34 = vsel %vm313_vm4, %v310_v16, 0.0  ;;  %v322_v35 = vsel %vm321_vm5, %v318_v21, 0.0  ;;  %v331_v36 = vsel %vm330_vm6, %v327_v22, 0.0  ;;  %v336_v37 = vld [vmem:[#allocation2 + $0x3] sm:$0xff] }
  0x6b   : > { %v643_v39 = vld [vmem:[#allocation8 + $0x3] ss:$0 sm:$0xff]  ;;  %v317_v41 = vmul.f32 %v640_v17, %v314_v34  ;;  %v325_v42 = vmul.f32 %v641_v27, %v322_v35  ;;  %v334_v43 = vmul.f32 %v642_v32, %v331_v36  ;;  %v340_v46 = vsel %vm339_vm7, %v336_v37, 0.0 }
  0x6c   : > { %v299_v40 = vadd.f32 %v298_v25, %v290_v33  ;;  %v343_v47 = vmul.f32 %v643_v39, %v340_v46 }
  0x6d   : > { %v326_v45 = vadd.f32 %v325_v42, %v317_v41 }
  0x6e   : > { %v308_v44 = vadd.f32 %v307_v28, %v299_v40 }
  0x6f   : > { %v335_v48 = vadd.f32 %v334_v43, %v326_v45 }
  0x70   : > { %309 = vst [vmem:[%s1045_s22] sm:$0xff] %v308_v44 }
  0x71   : > { %v344_v49 = vadd.f32 %v343_v47, %v335_v48 }
  0x73   : > { %345 = vst [vmem:[%s1045_s22 + $0x8] sm:$0xff] %v344_v49 }
  0x74 PF: > { %p530_p6 = scmp.gt.s32.totalorder %s268_s4, 64 }
  0x76   : > { %349 = sbr.rel (%p530_p6) target bundleno = 139 (0x8b), region = 52 }
  0x7b   : > { %v350_v50 = vld [vmem:[%s1023_s25] sm:$0xff] }
  0x7c   : > { %v644_v51 = vld [vmem:[#allocation8] ss:$0 sm:$0xff]  ;;  %v354_v52 = vld [vmem:[%s1023_s25 + $0x1] sm:$0xff] }
  0x7d   : > { %v645_v53 = vld [vmem:[#allocation8 + $0x1] ss:$0 sm:$0xff]  ;;  %v353_v54 = vmul.f32 %v644_v51, %v350_v50  ;;  %v359_v55 = vld [vmem:[%s1023_s25 + $0x2] sm:$0xff]  ;;  %v648_v62 = vld [vmem:[#allocation8] ss:$0 sm:$0xff] }
  0x7e   : > { %v646_v56 = vld [vmem:[#allocation8 + $0x2] ss:$0 sm:$0xff]  ;;  %v357_v57 = vmul.f32 %v645_v53, %v354_v52  ;;  %v364_v58 = vld [vmem:[%s1023_s25 + $0x3] sm:$0xff]  ;;  %v649_v2 = vld [vmem:[#allocation8 + $0x1] ss:$0 sm:$0xff] }
  0x7f   : > { %v647_v59 = vld [vmem:[#allocation8 + $0x3] ss:$0 sm:$0xff]  ;;  %v362_v60 = vmul.f32 %v646_v56, %v359_v55  ;;  %v650_v5 = vld [vmem:[#allocation8 + $0x2] ss:$0 sm:$0xff] }
  0x80   : > { %v370_v61 = vld [vmem:[#allocation2] sm:$0xff]  ;;  %v358_v63 = vadd.f32 %v357_v57, %v353_v54  ;;  %v367_v0 = vmul.f32 %v647_v59, %v364_v58 }
  0x81   : > { %v374_v1 = vld [vmem:[#allocation2 + $0x1] sm:$0xff]  ;;  %v373_v3 = vmul.f32 %v648_v62, %v370_v61 }
  0x82   : > { %v379_v4 = vld [vmem:[#allocation2 + $0x2] sm:$0xff]  ;;  %v363_v6 = vadd.f32 %v362_v60, %v358_v63  ;;  %v377_v7 = vmul.f32 %v649_v2, %v374_v1 }
  0x83   : > { %v384_v8 = vld [vmem:[#allocation2 + $0x3] sm:$0xff]  ;;  %v382_v10 = vmul.f32 %v650_v5, %v379_v4 }
  0x84   : > { %v651_v9 = vld [vmem:[#allocation8 + $0x3] ss:$0 sm:$0xff]  ;;  %v368_v11 = vadd.f32 %v367_v0, %v363_v6  ;;  %v378_v12 = vadd.f32 %v377_v7, %v373_v3 }
  0x85   : > { %v387_v13 = vmul.f32 %v651_v9, %v384_v8 }
  0x86   : > { %369 = vst [vmem:[%s1045_s22] sm:$0xff] %v368_v11  ;;  %v383_v14 = vadd.f32 %v382_v10, %v378_v12 }
  0x88   : > { %v388_v15 = vadd.f32 %v387_v13, %v383_v14 }
  0x8a   : > { %389 = vst [vmem:[%s1045_s22 + $0x8] sm:$0xff] %v388_v15 }
  0x8b PF: > { %s402_s25 = scalar_lea.hbm %s1115_s3, %s1040_s21  ;;  %s403_s2 = sshll.u32 %s1045_s22, 4  ;;  %s404_s2 = int_to_ptr.vmem [resolvable:$true] %s403_s2 }
  0x8c   : > { %s405_s17 = sshll.u32 %s402_s25, 4  ;;  %s391_s27 = scalar_lea.sflag [#allocation5], %s1019_s12  ;;  %s406_s17 = int_to_ptr.hbm [resolvable:$true] %s405_s17 }
  0x8d   : > { %s756_s6 = sshra.s32 %s406_s17, 4  ;;  %s762_s19 = scalar_lea.hbm %s1115_s3, 64  ;;  %s757_s6 = int_to_ptr.hbm [resolvable:$true] %s756_s6 }
  0x8e   : > { %s758_s9 = scalar_lea.hbm %s757_s6, 16  ;;  %p763_p2 = scmp.lt.s32.totalorder %s757_s6, %s1115_s3 }
  0x8f   : > { %p759_p7 = scmp.ne.s32.totalorder %s757_s6, %s758_s9  ;;  %p764_p5 = scmp.lt.s32.totalorder %s762_s19, %s758_s9 }
  0x91   : > { %p760_p3 = pnand %p759_p7, %p955_p9  ;;  %p765_p12 = por %p764_p5, %p763_p2 }
  0x93   : > { %p761_p1 = pneg %p760_p3 }
  0x95   : > { %p766_p11 = pnand %p765_p12, %p761_p1 }
  0x97   : > { %769 = shalt.err (!%p766_p11)
}
  0x98   : > { %s845_s12 = smov 128   ;;  %s846_s21 = smov 8  }
  0x99   : > { %554 = dma.vmem_to_hbm [thread:$0]  (%p955_p9), %s404_s2, 256, %s406_s17, %s391_s27, %s845_s12, %s845_s12, %s846_s21  }
  0x9a PF: > { %p574_p13 = scmp.ge.s32.totalorder %s840_s18, 2  ;;  %s420_s22 = sand.u32 1, %s828_s15  }
  0x9b   : > { %s421_s28 = scalar_lea.sflag [#allocation5], %s420_s22 }
  0x9c   : > { %p568_p10 = pnand %p574_p13, %p922_p8 }
  0x9e   : > { %p569_p0 = pneg %p568_p10 }
  0xa0   : > { %811 = dma.done.wait (%p569_p0), %s421_s28, 256  }
  0xa1   : > { %813 = vsyncadd (%p569_p0), %s421_s28, 4294967040  ;;  %s1138_s24 = sld [smem:[#allocation14_spill]]  ;;  %p19_p9 = scmp.ge.s32.totalorder %s939_s30, 6  }
  0xa2   : > { %s1139_s17 = sld [smem:[#allocation15_spill]]  ;;  %s1140_s12 = smov %s820_s13 }
  0xa3   : > { %s1141_s13 = smov %s824_s14  ;;  %s1142_s14 = smov %s993_s20 }
  0xa4   : > { %s1143_s15 = smov %s832_s16  ;;  %s1145_s18 = smov %s939_s30 }
  0xa5   :  { %21 = sbr.rel (!%p19_p9) target bundleno = 12 (0xc), region = 102 }
  0xa7   : > { %s1144_s16 = smov %s1138_s24 }
  0xaa   :  { %427 = vsyncpa [#allocation4], 1 }
  0xab   :  { %429 = vsyncpa [#allocation4 + $0x1], 1 }
  0xac   :  { %430 = vsyncpa [#allocation7], 1 }
  0xad   :  { %432 = vsyncpa [#allocation7 + $0x1], 1 }
  0xae   :  { %433 = vsyncpa [#allocation5], 1 }
  0xaf   :  { %435 = vsyncpa [#allocation5 + $0x1], 1 }

</bundles_post_ra>
